<compile_context>
chip_gen: v5e
topology: v5e:2x2
jax: 0.10.0
libtpu: 0.0.40
codegen_flags: <defaults>
</compile_context>

<pallas_src>
import jax
import jax.numpy as jnp
from jax.experimental import pallas as pl
from jax.experimental.pallas import tpu as pltpu


# ---------------------------------------------------------------------------
# Path 1: direct HBM -> HBM DMA copy (primary materializing path)
# ---------------------------------------------------------------------------

def _dma_identity_kernel(x_hbm_ref, o_hbm_ref, sem):
    # Bulk DMA of the whole array: no VMEM staging, no grid, no vld/vst slots.
    cp = pltpu.make_async_copy(x_hbm_ref, o_hbm_ref, sem)
    cp.start()
    cp.wait()


def identity_first_stage_pallas(x: jax.Array) -> jax.Array:
    """Identity that materializes a fresh buffer via one HBM->HBM DMA."""
    nbytes = x.size * jnp.dtype(x.dtype).itemsize
    return pl.pallas_call(
        _dma_identity_kernel,
        out_shape=jax.ShapeDtypeStruct(x.shape, x.dtype),
        in_specs=[pl.BlockSpec(memory_space=pl.ANY)],
        out_specs=pl.BlockSpec(memory_space=pl.ANY),
        scratch_shapes=[pltpu.SemaphoreType.DMA],
        cost_estimate=pl.CostEstimate(
            flops=0, transcendentals=0, bytes_accessed=2 * nbytes),
    )(x)


# ---------------------------------------------------------------------------
# Path 2: tiled VMEM-staged copy (corrected per review; optional)
# ---------------------------------------------------------------------------

_TILE_BYTES = 4 << 20  # ~4 MiB per tile; 4x (double-buffered in+out) = 16 MiB


def _tiled_copy_kernel(x_ref, o_ref):
    o_ref[...] = x_ref[...]


def _plan_tiled_layout(total: int, dtype):
    """Pick (lane, rows, tile_rows) with NO padding; None -> use DMA path."""
    itemsize = jnp.dtype(dtype).itemsize
    pack = {4: 8, 2: 16, 1: 32}.get(itemsize, 8)   # sublane pack per dtype

    lane = None
    for cand in (1024, 512, 256, 128):              # lane-dense, unmasked vst
        if total % cand == 0:
            lane = cand
            break
    if lane is None:
        return None

    rows = total // lane
    budget_rows = max(1, _TILE_BYTES // (lane * itemsize))  # constant tile bytes

    if rows <= budget_rows:
        if rows % pack == 0 and rows >= 2 * pack:
            # Split into 2 tiles so the "parallel" axis spans both v7x TCs.
            tile_rows = (((rows // 2) + pack - 1) // pack) * pack
        else:
            tile_rows = rows            # full-dim block: always layout-legal
    else:
        if rows % pack != 0:
            return None                 # keep kernel simple; DMA handles it
        tile_rows = max(pack, (budget_rows // pack) * pack)

    return lane, rows, tile_rows


def identity_first_stage_pallas_tiled(x: jax.Array) -> jax.Array:
    """Identity copy through VMEM-staged, pipelined lane-dense tiles."""
    plan = _plan_tiled_layout(x.size, x.dtype)
    if plan is None:
        return identity_first_stage_pallas(x)
    lane, rows, tile_rows = plan
    nbytes = x.size * jnp.dtype(x.dtype).itemsize

    slab = x.reshape(rows, lane)        # pure reshape — no pad, no slice
    out = pl.pallas_call(
        _tiled_copy_kernel,
        out_shape=jax.ShapeDtypeStruct((rows, lane), slab.dtype),
        grid=(pl.cdiv(rows, tile_rows),),
        in_specs=[pl.BlockSpec((tile_rows, lane), lambda i: (i, 0))],
        out_specs=pl.BlockSpec((tile_rows, lane), lambda i: (i, 0)),
        compiler_params=pltpu.CompilerParams(
            dimension_semantics=("parallel",),   # shard grid across TCs on v7x
            vmem_limit_bytes=32 << 20,           # double-buffered in+out fits
        ),
        cost_estimate=pl.CostEstimate(
            flops=0, transcendentals=0, bytes_accessed=2 * nbytes),
        # NOTE: no input_output_aliases — the point of this path is a fresh
        # output buffer; aliasing either defeats that or forces a defensive
        # extra copy (review item 1).
    )(slab)
    return out.reshape(x.shape)


def identity_first_stage_forward(x: jax.Array) -> jax.Array:
    """IdentityFirstStage.forward: pure identity — zero HBM traffic."""
    return x


# ---------------------------------------------------------------------------
# Module wrapper
# ---------------------------------------------------------------------------

class IdentityFirstStage:
    """JAX port of ldm.models.autoencoder.IdentityFirstStage (no params).

    All methods are zero-cost identities by default (matching PyTorch).
    Set `materialize=True` to route through the Pallas HBM->HBM DMA copy
    when a fresh output buffer is explicitly required.
    """

    def __init__(self, *args, vq_interface: bool = False,
                 materialize: bool = False, **kwargs):
        self.vq_interface = vq_interface
        self._fwd = (identity_first_stage_pallas if materialize
                     else identity_first_stage_forward)

    def encode(self, x, *args, **kwargs):
        return self._fwd(x)

    def decode(self, x, *args, **kwargs):
        return self._fwd(x)

    def quantize(self, x, *args, **kwargs):
        x = self._fwd(x)
        if self.vq_interface:
            return (x, None, [None, None, None])
        return x

    def __call__(self, x, *args, **kwargs):
        return self._fwd(x)


if __name__ == "__main__":
    key = jax.random.PRNGKey(0)
    # NCHW: batch=2, channels=4, spatial=16x16.
    x = jax.random.normal(key, (2, 4, 16, 16), dtype=jnp.float32)

    # Default module path: zero-copy identity (the actual module semantics).
    model = IdentityFirstStage(vq_interface=False)
    y_fast = model(x)
    assert y_fast.shape == x.shape and y_fast.dtype == x.dtype

    # Primary materializing path: single HBM->HBM DMA.
    y_dma = jax.block_until_ready(identity_first_stage_pallas(x))
    assert y_dma.shape == x.shape and y_dma.dtype == x.dtype
    assert bool(jnp.array_equal(y_dma, x))

    # Secondary materializing path: tiled VMEM-staged copy.
    y_tiled = jax.block_until_ready(identity_first_stage_pallas_tiled(x))
    assert y_tiled.shape == x.shape and y_tiled.dtype == x.dtype
    assert bool(jnp.array_equal(y_tiled, x))

    # vq_interface tuple shape.
    model_vq = IdentityFirstStage(vq_interface=True)
    q, _, extras = model_vq.quantize(x)
    assert bool(jnp.array_equal(q, x)) and extras == [None, None, None]

    print("KERNEL_OK")
</pallas_src>

<mosaic_0001>
module attributes {stable_mosaic.version = 11 : i64} {
  func.func @_dma_identity_kernel(%arg0: memref<2x4x16x16xf32, #tpu.memory_space<any>>, %arg1: memref<2x4x16x16xf32, #tpu.memory_space<any>>, %arg2: memref<!tpu.dma_semaphore, #tpu.memory_space<semaphore_mem>>) attributes {dimension_semantics = [], scalar_prefetch = 0 : i64, scratch_operands = 1 : i64, tpu.core_type = #tpu.core_type<tc>} {
    tpu.enqueue_dma source(%arg0 : memref<2x4x16x16xf32, #tpu.memory_space<any>>) target(%arg1 : memref<2x4x16x16xf32, #tpu.memory_space<any>>) target_semaphore(%arg2 : memref<!tpu.dma_semaphore, #tpu.memory_space<semaphore_mem>>)
    tpu.wait_dma2 semaphore(%arg2 : memref<!tpu.dma_semaphore, #tpu.memory_space<semaphore_mem>>) src(%arg0 : memref<2x4x16x16xf32, #tpu.memory_space<any>>) dst(%arg1 : memref<2x4x16x16xf32, #tpu.memory_space<any>>)
    return
  }
}

</mosaic_0001>

<bundles_post_ra>
// kernel: tpu_custom_call.1
= control target key start
LH: loop header
LB: loop body
LE: loop exit
PB: predicated region body
PF: predicated region fallthrough
CT: control target
= control target key end

     0   :  { %s34_s12 = smov [#allocation2]   ;;  %s35_s13 = smov [#allocation3]   ;;  %s53_s0 = inlined_call_operand.hbm [shape: f32[2,4,16,16], index: 0, kind: input, shape index: {}]   ;;  %s54_s1 = inlined_call_operand.hbm [shape: f32[2,4,16,16], index: 1, kind: output, shape index: {}]  }
   0x1   :  { %s10_s8 = sshll.u32 %s53_s0, 4  ;;  %s12_s11 = sshll.u32 %s54_s1, 4  ;;  %s11_s8 = int_to_ptr.hbm [resolvable:$true] %s10_s8  ;;  %s13_s11 = int_to_ptr.hbm [resolvable:$true] %s12_s11 }
   0x2   :  { %s36_s14 = smov 0  }
   0x3   :  { %16 = dma.general %s11_s8, 2048, %s13_s11, %s34_s12, %s35_s13, [#allocation4], %s36_s14, 0  }
   0x4   :  { %32 = dma.done.wait [#allocation2], 2048 }
   0x5   :  { %33 = vsyncadd [#allocation2], 4294965248 }
   0x6   :  { %22 = vsyncmov [#allocation2] }
   0x9   :  { %s23_s15 = vpop.sfrf %22 }
   0xa   :  { %p28_p0 = scmp.ne.s32.totalorder %s23_s15, 0 }
   0xc   :  { %27 = shalt.err (%p28_p0)  }

</bundles_post_ra>
